<compile_context>
chip_gen: v5e
topology: v5e:2x2
jax: 0.10.0
libtpu: 0.0.40
codegen_flags: <defaults>
</compile_context>

<pallas_src>
import functools

import jax
import jax.numpy as jnp
from jax import lax
from jax.experimental import pallas as pl
from jax.experimental.pallas import tpu as pltpu

HIDDEN_SIZE = 16
INPUT_SIZE = 2
NUM_LAYERS = 1  # single-layer GRU


def gru_kernel(x_ref, wih_ref, whh_ref, bih_ref, bhh_ref, y_ref, hn_ref, *,
               seq_len, batch):
    """Whole GRU recurrence in a single invocation (no time grid).

    x_ref   : (T*B, I)  flattened input sequence (VMEM resident, ~256 B)
    wih_ref : (I, 3H)   input->hidden weights, gate order [r | z | n]
    whh_ref : (H, 3H)   hidden->hidden weights
    bih_ref : (1, 3H)   input bias
    bhh_ref : (1, 3H)   hidden bias
    y_ref   : (T*B, H)  all hidden states (single HBM writeback at kernel end)
    hn_ref  : (1, B, H) final hidden state (written once after the loop)
    """
    T, B = seq_len, batch
    I = x_ref.shape[1]
    H = whh_ref.shape[0]

    x_flat = x_ref[...]          # (T*B, I) float32
    w_ih = wih_ref[...]          # (I, 3H)
    w_hh = whh_ref[...]          # (H, 3H)
    b_ih = bih_ref[...]          # (1, 3H)
    b_hh = bhh_ref[...]          # (1, 3H)

    # ---- hoisted, one-time work (off the serial chain) ---------------------
    # Fold b_hh for the r/z gates into the hoisted input projection (it
    # commutes with gh there); only b_hh_n must stay inside the per-step
    # r * (gh_n + b_hh_n) factor to match PyTorch nn.GRU semantics.
    bias_rz = b_ih[:, :2 * H] + b_hh[:, :2 * H]    # (1, 2H)
    bias_n = b_ih[:, 2 * H:]                       # (1, H)
    b_hh_n = b_hh[:, 2 * H:]                       # (1, H), hoisted lane slice

    w_ih_rz = w_ih[:, :2 * H]                      # (I, 2H)
    w_ih_n = w_ih[:, 2 * H:]                       # (I, H)

    # Input projection for ALL timesteps. I == 2 is far too small for the MXU,
    # so use VPU broadcast-FMAs on the flattened (T*B, ...) layout. Gate
    # slices (rz vs n) are produced here once, so the loop body never slices
    # gi lanes.
    gi_rz_all = bias_rz + x_flat[:, 0:1] * w_ih_rz[0:1, :]       # (T*B, 2H)
    gi_n_all = bias_n + x_flat[:, 0:1] * w_ih_n[0:1, :]          # (T*B, H)
    for i in range(1, I):                                        # I static (=2)
        gi_rz_all = gi_rz_all + x_flat[:, i:i + 1] * w_ih_rz[i:i + 1, :]
        gi_n_all = gi_n_all + x_flat[:, i:i + 1] * w_ih_n[i:i + 1, :]

    # ---- serial recurrence --------------------------------------------------
    def gate_update(t, h_prev, gh=None):
        s = t * B                                  # static Python int
        if gh is None:                             # h_prev == 0  =>  gh == 0
            a_rz = gi_rz_all[s:s + B, :]
            gh_n = b_hh_n
        else:
            a_rz = gi_rz_all[s:s + B, :] + gh[:, :2 * H]
            gh_n = gh[:, 2 * H:] + b_hh_n
        rz = jax.nn.sigmoid(a_rz)                  # fused r/z: ONE EUP push
        r = rz[:, :H]
        z = rz[:, H:]
        n = jnp.tanh(gi_n_all[s:s + B, :] + r * gh_n)
        h_new = (1.0 - z) * n + z * h_prev
        y_ref[s:s + B, :] = h_new                  # VMEM store, flushed once
        return h_new

    # Step 0: h0 == 0 so gh == 0 -- skip the matmul entirely.
    h = gate_update(0, jnp.zeros((B, H), jnp.float32))

    # Remaining steps: only h @ W_hh stays on the per-step critical path.
    # T is tiny and static, so unroll in Python for full scheduler visibility.
    for t in range(1, T):
        gh = jnp.dot(h, w_hh, preferred_element_type=jnp.float32)  # (B, 3H)
        h = gate_update(t, h, gh)

    hn_ref[0] = h                                  # final state, written once


@jax.jit
def gru_encoder_forward(x, w_ih_t, w_hh_t, b_ih, b_hh):
    """Pallas GRU forward. x: (T, B, I) float32. Returns (y, h_n)."""
    T, B, I = x.shape
    H = w_hh_t.shape[0]
    G = 3 * H

    x_flat = x.reshape(T * B, I)   # free wrapper-side reshape (denser vregs)
    vmem = pl.BlockSpec(memory_space=pltpu.MemorySpace.VMEM)
    kernel = functools.partial(gru_kernel, seq_len=T, batch=B)

    y_flat, h_n = pl.pallas_call(
        kernel,
        out_shape=(
            jax.ShapeDtypeStruct((T * B, H), jnp.float32),
            jax.ShapeDtypeStruct((NUM_LAYERS, B, H), jnp.float32),
        ),
        in_specs=[vmem, vmem, vmem, vmem, vmem],
        out_specs=(vmem, vmem),
        cost_estimate=pl.CostEstimate(
            flops=2 * T * B * (I + H) * G,
            transcendentals=T * B * G,
            bytes_accessed=4 * (T * B * I + I * G + H * G + 2 * G
                                + T * B * H + B * H),
        ),
    )(x_flat, w_ih_t, w_hh_t, b_ih, b_hh)

    return y_flat.reshape(T, B, H), h_n


def gru_reference(x, w_ih_t, w_hh_t, b_ih, b_hh):
    """Pure-JAX reference matching PyTorch nn.GRU semantics (gate order r,z,n)."""
    T, B, I = x.shape
    H = w_hh_t.shape[0]

    def step(h_prev, x_t):
        gi = x_t @ w_ih_t + b_ih
        gh = h_prev @ w_hh_t + b_hh
        r = jax.nn.sigmoid(gi[:, :H] + gh[:, :H])
        z = jax.nn.sigmoid(gi[:, H:2 * H] + gh[:, H:2 * H])
        n = jnp.tanh(gi[:, 2 * H:] + r * gh[:, 2 * H:])
        h = (1.0 - z) * n + z * h_prev
        return h, h

    h0 = jnp.zeros((B, H), jnp.float32)
    h_last, ys = lax.scan(step, h0, x)
    return ys, h_last[None]


def init_params(key, input_size, hidden_size):
    """Deterministic init mimicking PyTorch's U(-1/sqrt(H), 1/sqrt(H))."""
    k1, k2, k3, k4 = jax.random.split(key, 4)
    bound = 1.0 / jnp.sqrt(hidden_size)
    G = 3 * hidden_size
    # PyTorch stores weight_ih_l0: (3H, I). We keep the transpose (I, 3H).
    w_ih_t = jax.random.uniform(k1, (input_size, G), jnp.float32, -bound, bound)
    w_hh_t = jax.random.uniform(k2, (hidden_size, G), jnp.float32, -bound, bound)
    b_ih = jax.random.uniform(k3, (1, G), jnp.float32, -bound, bound)
    b_hh = jax.random.uniform(k4, (1, G), jnp.float32, -bound, bound)
    return w_ih_t, w_hh_t, b_ih, b_hh


if __name__ == "__main__":
    key = jax.random.PRNGKey(0)
    k_x, k_p = jax.random.split(key)

    T, B = 8, 4  # small seq-len and batch
    x = jax.random.normal(k_x, (T, B, INPUT_SIZE), jnp.float32)
    w_ih_t, w_hh_t, b_ih, b_hh = init_params(k_p, INPUT_SIZE, HIDDEN_SIZE)

    y, h_n = gru_encoder_forward(x, w_ih_t, w_hh_t, b_ih, b_hh)
    y = jax.block_until_ready(y)
    h_n = jax.block_until_ready(h_n)

    y_ref, h_ref = gru_reference(x, w_ih_t, w_hh_t, b_ih, b_hh)
    assert y.shape == (T, B, HIDDEN_SIZE)
    assert h_n.shape == (NUM_LAYERS, B, HIDDEN_SIZE)
    assert jnp.allclose(y, y_ref, atol=1e-5, rtol=1e-5)
    assert jnp.allclose(h_n, h_ref, atol=1e-5, rtol=1e-5)

    print("KERNEL_OK")
</pallas_src>

<mosaic_0001>
module attributes {stable_mosaic.version = 11 : i64} {
  func.func @gru_kernel(%arg0: memref<32x2xf32, #tpu.memory_space<vmem>>, %arg1: memref<2x48xf32, #tpu.memory_space<vmem>>, %arg2: memref<16x48xf32, #tpu.memory_space<vmem>>, %arg3: memref<1x48xf32, #tpu.memory_space<vmem>>, %arg4: memref<1x48xf32, #tpu.memory_space<vmem>>, %arg5: memref<32x16xf32, #tpu.memory_space<vmem>>, %arg6: memref<1x4x16xf32, #tpu.memory_space<vmem>>) attributes {dimension_semantics = [], scalar_prefetch = 0 : i64, scratch_operands = 0 : i64, tpu.core_type = #tpu.core_type<tc>} {
    %c0 = arith.constant 0 : index
    %c0_0 = arith.constant 0 : index
    %0 = vector.load %arg0[%c0, %c0_0] : memref<32x2xf32, #tpu.memory_space<vmem>>, vector<32x2xf32>
    %c0_1 = arith.constant 0 : index
    %c0_2 = arith.constant 0 : index
    %1 = vector.load %arg1[%c0_1, %c0_2] : memref<2x48xf32, #tpu.memory_space<vmem>>, vector<2x48xf32>
    %c0_3 = arith.constant 0 : index
    %c0_4 = arith.constant 0 : index
    %2 = vector.load %arg2[%c0_3, %c0_4] : memref<16x48xf32, #tpu.memory_space<vmem>>, vector<16x48xf32>
    %c0_5 = arith.constant 0 : index
    %c0_6 = arith.constant 0 : index
    %3 = vector.load %arg3[%c0_5, %c0_6] : memref<1x48xf32, #tpu.memory_space<vmem>>, vector<1x48xf32>
    %c0_7 = arith.constant 0 : index
    %c0_8 = arith.constant 0 : index
    %4 = vector.load %arg4[%c0_7, %c0_8] : memref<1x48xf32, #tpu.memory_space<vmem>>, vector<1x48xf32>
    %5 = vector.extract_strided_slice %3 {offsets = [0, 0], sizes = [1, 32], strides = [1, 1]} : vector<1x48xf32> to vector<1x32xf32>
    %6 = vector.extract_strided_slice %4 {offsets = [0, 0], sizes = [1, 32], strides = [1, 1]} : vector<1x48xf32> to vector<1x32xf32>
    %7 = arith.addf %5, %6 : vector<1x32xf32>
    %8 = vector.extract_strided_slice %3 {offsets = [0, 32], sizes = [1, 16], strides = [1, 1]} : vector<1x48xf32> to vector<1x16xf32>
    %9 = vector.extract_strided_slice %4 {offsets = [0, 32], sizes = [1, 16], strides = [1, 1]} : vector<1x48xf32> to vector<1x16xf32>
    %10 = vector.extract_strided_slice %1 {offsets = [0, 0], sizes = [2, 32], strides = [1, 1]} : vector<2x48xf32> to vector<2x32xf32>
    %11 = vector.extract_strided_slice %1 {offsets = [0, 32], sizes = [2, 16], strides = [1, 1]} : vector<2x48xf32> to vector<2x16xf32>
    %12 = vector.extract_strided_slice %0 {offsets = [0, 0], sizes = [32, 1], strides = [1, 1]} : vector<32x2xf32> to vector<32x1xf32>
    %13 = vector.extract_strided_slice %10 {offsets = [0, 0], sizes = [1, 32], strides = [1, 1]} : vector<2x32xf32> to vector<1x32xf32>
    %14 = vector.broadcast %12 : vector<32x1xf32> to vector<32x32xf32>
    %15 = vector.broadcast %13 : vector<1x32xf32> to vector<32x32xf32>
    %16 = arith.mulf %14, %15 : vector<32x32xf32>
    %17 = vector.broadcast %7 : vector<1x32xf32> to vector<32x32xf32>
    %18 = arith.addf %17, %16 : vector<32x32xf32>
    %19 = vector.extract_strided_slice %0 {offsets = [0, 0], sizes = [32, 1], strides = [1, 1]} : vector<32x2xf32> to vector<32x1xf32>
    %20 = vector.extract_strided_slice %11 {offsets = [0, 0], sizes = [1, 16], strides = [1, 1]} : vector<2x16xf32> to vector<1x16xf32>
    %21 = vector.broadcast %19 : vector<32x1xf32> to vector<32x16xf32>
    %22 = vector.broadcast %20 : vector<1x16xf32> to vector<32x16xf32>
    %23 = arith.mulf %21, %22 : vector<32x16xf32>
    %24 = vector.broadcast %8 : vector<1x16xf32> to vector<32x16xf32>
    %25 = arith.addf %24, %23 : vector<32x16xf32>
    %26 = vector.extract_strided_slice %0 {offsets = [0, 1], sizes = [32, 1], strides = [1, 1]} : vector<32x2xf32> to vector<32x1xf32>
    %27 = vector.extract_strided_slice %10 {offsets = [1, 0], sizes = [1, 32], strides = [1, 1]} : vector<2x32xf32> to vector<1x32xf32>
    %28 = vector.broadcast %26 : vector<32x1xf32> to vector<32x32xf32>
    %29 = vector.broadcast %27 : vector<1x32xf32> to vector<32x32xf32>
    %30 = arith.mulf %28, %29 : vector<32x32xf32>
    %31 = arith.addf %18, %30 : vector<32x32xf32>
    %32 = vector.extract_strided_slice %0 {offsets = [0, 1], sizes = [32, 1], strides = [1, 1]} : vector<32x2xf32> to vector<32x1xf32>
    %33 = vector.extract_strided_slice %11 {offsets = [1, 0], sizes = [1, 16], strides = [1, 1]} : vector<2x16xf32> to vector<1x16xf32>
    %34 = vector.broadcast %32 : vector<32x1xf32> to vector<32x16xf32>
    %35 = vector.broadcast %33 : vector<1x16xf32> to vector<32x16xf32>
    %36 = arith.mulf %34, %35 : vector<32x16xf32>
    %37 = arith.addf %25, %36 : vector<32x16xf32>
    %cst = arith.constant 0.000000e+00 : f32
    %38 = vector.broadcast %cst : f32 to vector<4x16xf32>
    %39 = vector.extract_strided_slice %31 {offsets = [0, 0], sizes = [4, 32], strides = [1, 1]} : vector<32x32xf32> to vector<4x32xf32>
    %40 = arith.negf %39 : vector<4x32xf32>
    %41 = math.exp %40 : vector<4x32xf32>
    %cst_9 = arith.constant 1.000000e+00 : f32
    %42 = vector.broadcast %cst_9 : f32 to vector<4x32xf32>
    %43 = arith.addf %42, %41 : vector<4x32xf32>
    %44 = arith.divf %42, %43 : vector<4x32xf32>
    %45 = vector.extract_strided_slice %44 {offsets = [0, 0], sizes = [4, 16], strides = [1, 1]} : vector<4x32xf32> to vector<4x16xf32>
    %46 = vector.extract_strided_slice %44 {offsets = [0, 16], sizes = [4, 16], strides = [1, 1]} : vector<4x32xf32> to vector<4x16xf32>
    %47 = vector.extract_strided_slice %37 {offsets = [0, 0], sizes = [4, 16], strides = [1, 1]} : vector<32x16xf32> to vector<4x16xf32>
    %48 = vector.broadcast %9 : vector<1x16xf32> to vector<4x16xf32>
    %49 = arith.mulf %45, %48 : vector<4x16xf32>
    %50 = arith.addf %47, %49 : vector<4x16xf32>
    %51 = math.tanh %50 : vector<4x16xf32>
    %cst_10 = arith.constant 1.000000e+00 : f32
    %52 = vector.broadcast %cst_10 : f32 to vector<4x16xf32>
    %53 = arith.subf %52, %46 : vector<4x16xf32>
    %54 = arith.mulf %53, %51 : vector<4x16xf32>
    %55 = arith.mulf %46, %38 : vector<4x16xf32>
    %56 = arith.addf %54, %55 : vector<4x16xf32>
    %c0_11 = arith.constant 0 : index
    %c0_12 = arith.constant 0 : index
    %57 = vector.load %arg5[%c0_11, %c0_12] : memref<32x16xf32, #tpu.memory_space<vmem>>, vector<4x16xf32>
    tpu.vector_store %arg5[%c0_11, %c0_12], %56 {strides = array<i32>} : memref<32x16xf32, #tpu.memory_space<vmem>>, vector<4x16xf32>,
    %cst_13 = arith.constant dense<0.000000e+00> : vector<4x48xf32>
    %58 = tpu.matmul %56, %2, %cst_13 {dimension_numbers = #tpu.dot_dimension_numbers<[1], [0], [0], [1], [0, 0, 1, 1], [], []>} : vector<4x16xf32>, vector<16x48xf32>, vector<4x48xf32> -> vector<4x48xf32>
    %59 = vector.extract_strided_slice %31 {offsets = [4, 0], sizes = [4, 32], strides = [1, 1]} : vector<32x32xf32> to vector<4x32xf32>
    %60 = vector.extract_strided_slice %58 {offsets = [0, 0], sizes = [4, 32], strides = [1, 1]} : vector<4x48xf32> to vector<4x32xf32>
    %61 = arith.addf %59, %60 : vector<4x32xf32>
    %62 = vector.extract_strided_slice %58 {offsets = [0, 32], sizes = [4, 16], strides = [1, 1]} : vector<4x48xf32> to vector<4x16xf32>
    %63 = vector.broadcast %9 : vector<1x16xf32> to vector<4x16xf32>
    %64 = arith.addf %62, %63 : vector<4x16xf32>
    %65 = arith.negf %61 : vector<4x32xf32>
    %66 = math.exp %65 : vector<4x32xf32>
    %cst_14 = arith.constant 1.000000e+00 : f32
    %67 = vector.broadcast %cst_14 : f32 to vector<4x32xf32>
    %68 = arith.addf %67, %66 : vector<4x32xf32>
    %69 = arith.divf %67, %68 : vector<4x32xf32>
    %70 = vector.extract_strided_slice %69 {offsets = [0, 0], sizes = [4, 16], strides = [1, 1]} : vector<4x32xf32> to vector<4x16xf32>
    %71 = vector.extract_strided_slice %69 {offsets = [0, 16], sizes = [4, 16], strides = [1, 1]} : vector<4x32xf32> to vector<4x16xf32>
    %72 = vector.extract_strided_slice %37 {offsets = [4, 0], sizes = [4, 16], strides = [1, 1]} : vector<32x16xf32> to vector<4x16xf32>
    %73 = arith.mulf %70, %64 : vector<4x16xf32>
    %74 = arith.addf %72, %73 : vector<4x16xf32>
    %75 = math.tanh %74 : vector<4x16xf32>
    %cst_15 = arith.constant 1.000000e+00 : f32
    %76 = vector.broadcast %cst_15 : f32 to vector<4x16xf32>
    %77 = arith.subf %76, %71 : vector<4x16xf32>
    %78 = arith.mulf %77, %75 : vector<4x16xf32>
    %79 = arith.mulf %71, %56 : vector<4x16xf32>
    %80 = arith.addf %78, %79 : vector<4x16xf32>
    %c4 = arith.constant 4 : index
    %c0_16 = arith.constant 0 : index
    %81 = vector.load %arg5[%c4, %c0_16] : memref<32x16xf32, #tpu.memory_space<vmem>>, vector<4x16xf32>
    tpu.vector_store %arg5[%c4, %c0_16], %80 {strides = array<i32>} : memref<32x16xf32, #tpu.memory_space<vmem>>, vector<4x16xf32>,
    %cst_17 = arith.constant dense<0.000000e+00> : vector<4x48xf32>
    %82 = tpu.matmul %80, %2, %cst_17 {dimension_numbers = #tpu.dot_dimension_numbers<[1], [0], [0], [1], [0, 0, 1, 1], [], []>} : vector<4x16xf32>, vector<16x48xf32>, vector<4x48xf32> -> vector<4x48xf32>
    %83 = vector.extract_strided_slice %31 {offsets = [8, 0], sizes = [4, 32], strides = [1, 1]} : vector<32x32xf32> to vector<4x32xf32>
    %84 = vector.extract_strided_slice %82 {offsets = [0, 0], sizes = [4, 32], strides = [1, 1]} : vector<4x48xf32> to vector<4x32xf32>
    %85 = arith.addf %83, %84 : vector<4x32xf32>
    %86 = vector.extract_strided_slice %82 {offsets = [0, 32], sizes = [4, 16], strides = [1, 1]} : vector<4x48xf32> to vector<4x16xf32>
    %87 = vector.broadcast %9 : vector<1x16xf32> to vector<4x16xf32>
    %88 = arith.addf %86, %87 : vector<4x16xf32>
    %89 = arith.negf %85 : vector<4x32xf32>
    %90 = math.exp %89 : vector<4x32xf32>
    %cst_18 = arith.constant 1.000000e+00 : f32
    %91 = vector.broadcast %cst_18 : f32 to vector<4x32xf32>
    %92 = arith.addf %91, %90 : vector<4x32xf32>
    %93 = arith.divf %91, %92 : vector<4x32xf32>
    %94 = vector.extract_strided_slice %93 {offsets = [0, 0], sizes = [4, 16], strides = [1, 1]} : vector<4x32xf32> to vector<4x16xf32>
    %95 = vector.extract_strided_slice %93 {offsets = [0, 16], sizes = [4, 16], strides = [1, 1]} : vector<4x32xf32> to vector<4x16xf32>
    %96 = vector.extract_strided_slice %37 {offsets = [8, 0], sizes = [4, 16], strides = [1, 1]} : vector<32x16xf32> to vector<4x16xf32>
    %97 = arith.mulf %94, %88 : vector<4x16xf32>
    %98 = arith.addf %96, %97 : vector<4x16xf32>
    %99 = math.tanh %98 : vector<4x16xf32>
    %cst_19 = arith.constant 1.000000e+00 : f32
    %100 = vector.broadcast %cst_19 : f32 to vector<4x16xf32>
    %101 = arith.subf %100, %95 : vector<4x16xf32>
    %102 = arith.mulf %101, %99 : vector<4x16xf32>
    %103 = arith.mulf %95, %80 : vector<4x16xf32>
    %104 = arith.addf %102, %103 : vector<4x16xf32>
    %c8 = arith.constant 8 : index
    %c0_20 = arith.constant 0 : index
    %105 = vector.load %arg5[%c8, %c0_20] : memref<32x16xf32, #tpu.memory_space<vmem>>, vector<4x16xf32>
    tpu.vector_store %arg5[%c8, %c0_20], %104 {strides = array<i32>} : memref<32x16xf32, #tpu.memory_space<vmem>>, vector<4x16xf32>,
    %cst_21 = arith.constant dense<0.000000e+00> : vector<4x48xf32>
    %106 = tpu.matmul %104, %2, %cst_21 {dimension_numbers = #tpu.dot_dimension_numbers<[1], [0], [0], [1], [0, 0, 1, 1], [], []>} : vector<4x16xf32>, vector<16x48xf32>, vector<4x48xf32> -> vector<4x48xf32>
    %107 = vector.extract_strided_slice %31 {offsets = [12, 0], sizes = [4, 32], strides = [1, 1]} : vector<32x32xf32> to vector<4x32xf32>
    %108 = vector.extract_strided_slice %106 {offsets = [0, 0], sizes = [4, 32], strides = [1, 1]} : vector<4x48xf32> to vector<4x32xf32>
    %109 = arith.addf %107, %108 : vector<4x32xf32>
    %110 = vector.extract_strided_slice %106 {offsets = [0, 32], sizes = [4, 16], strides = [1, 1]} : vector<4x48xf32> to vector<4x16xf32>
    %111 = vector.broadcast %9 : vector<1x16xf32> to vector<4x16xf32>
    %112 = arith.addf %110, %111 : vector<4x16xf32>
    %113 = arith.negf %109 : vector<4x32xf32>
    %114 = math.exp %113 : vector<4x32xf32>
    %cst_22 = arith.constant 1.000000e+00 : f32
    %115 = vector.broadcast %cst_22 : f32 to vector<4x32xf32>
    %116 = arith.addf %115, %114 : vector<4x32xf32>
    %117 = arith.divf %115, %116 : vector<4x32xf32>
    %118 = vector.extract_strided_slice %117 {offsets = [0, 0], sizes = [4, 16], strides = [1, 1]} : vector<4x32xf32> to vector<4x16xf32>
    %119 = vector.extract_strided_slice %117 {offsets = [0, 16], sizes = [4, 16], strides = [1, 1]} : vector<4x32xf32> to vector<4x16xf32>
    %120 = vector.extract_strided_slice %37 {offsets = [12, 0], sizes = [4, 16], strides = [1, 1]} : vector<32x16xf32> to vector<4x16xf32>
    %121 = arith.mulf %118, %112 : vector<4x16xf32>
    %122 = arith.addf %120, %121 : vector<4x16xf32>
    %123 = math.tanh %122 : vector<4x16xf32>
    %cst_23 = arith.constant 1.000000e+00 : f32
    %124 = vector.broadcast %cst_23 : f32 to vector<4x16xf32>
    %125 = arith.subf %124, %119 : vector<4x16xf32>
    %126 = arith.mulf %125, %123 : vector<4x16xf32>
    %127 = arith.mulf %119, %104 : vector<4x16xf32>
    %128 = arith.addf %126, %127 : vector<4x16xf32>
    %c12 = arith.constant 12 : index
    %c0_24 = arith.constant 0 : index
    %129 = vector.load %arg5[%c12, %c0_24] : memref<32x16xf32, #tpu.memory_space<vmem>>, vector<4x16xf32>
    tpu.vector_store %arg5[%c12, %c0_24], %128 {strides = array<i32>} : memref<32x16xf32, #tpu.memory_space<vmem>>, vector<4x16xf32>,
    %cst_25 = arith.constant dense<0.000000e+00> : vector<4x48xf32>
    %130 = tpu.matmul %128, %2, %cst_25 {dimension_numbers = #tpu.dot_dimension_numbers<[1], [0], [0], [1], [0, 0, 1, 1], [], []>} : vector<4x16xf32>, vector<16x48xf32>, vector<4x48xf32> -> vector<4x48xf32>
    %131 = vector.extract_strided_slice %31 {offsets = [16, 0], sizes = [4, 32], strides = [1, 1]} : vector<32x32xf32> to vector<4x32xf32>
    %132 = vector.extract_strided_slice %130 {offsets = [0, 0], sizes = [4, 32], strides = [1, 1]} : vector<4x48xf32> to vector<4x32xf32>
    %133 = arith.addf %131, %132 : vector<4x32xf32>
    %134 = vector.extract_strided_slice %130 {offsets = [0, 32], sizes = [4, 16], strides = [1, 1]} : vector<4x48xf32> to vector<4x16xf32>
    %135 = vector.broadcast %9 : vector<1x16xf32> to vector<4x16xf32>
    %136 = arith.addf %134, %135 : vector<4x16xf32>
    %137 = arith.negf %133 : vector<4x32xf32>
    %138 = math.exp %137 : vector<4x32xf32>
    %cst_26 = arith.constant 1.000000e+00 : f32
    %139 = vector.broadcast %cst_26 : f32 to vector<4x32xf32>
    %140 = arith.addf %139, %138 : vector<4x32xf32>
    %141 = arith.divf %139, %140 : vector<4x32xf32>
    %142 = vector.extract_strided_slice %141 {offsets = [0, 0], sizes = [4, 16], strides = [1, 1]} : vector<4x32xf32> to vector<4x16xf32>
    %143 = vector.extract_strided_slice %141 {offsets = [0, 16], sizes = [4, 16], strides = [1, 1]} : vector<4x32xf32> to vector<4x16xf32>
    %144 = vector.extract_strided_slice %37 {offsets = [16, 0], sizes = [4, 16], strides = [1, 1]} : vector<32x16xf32> to vector<4x16xf32>
    %145 = arith.mulf %142, %136 : vector<4x16xf32>
    %146 = arith.addf %144, %145 : vector<4x16xf32>
    %147 = math.tanh %146 : vector<4x16xf32>
    %cst_27 = arith.constant 1.000000e+00 : f32
    %148 = vector.broadcast %cst_27 : f32 to vector<4x16xf32>
    %149 = arith.subf %148, %143 : vector<4x16xf32>
    %150 = arith.mulf %149, %147 : vector<4x16xf32>
    %151 = arith.mulf %143, %128 : vector<4x16xf32>
    %152 = arith.addf %150, %151 : vector<4x16xf32>
    %c16 = arith.constant 16 : index
    %c0_28 = arith.constant 0 : index
    %153 = vector.load %arg5[%c16, %c0_28] : memref<32x16xf32, #tpu.memory_space<vmem>>, vector<4x16xf32>
    tpu.vector_store %arg5[%c16, %c0_28], %152 {strides = array<i32>} : memref<32x16xf32, #tpu.memory_space<vmem>>, vector<4x16xf32>,
    %cst_29 = arith.constant dense<0.000000e+00> : vector<4x48xf32>
    %154 = tpu.matmul %152, %2, %cst_29 {dimension_numbers = #tpu.dot_dimension_numbers<[1], [0], [0], [1], [0, 0, 1, 1], [], []>} : vector<4x16xf32>, vector<16x48xf32>, vector<4x48xf32> -> vector<4x48xf32>
    %155 = vector.extract_strided_slice %31 {offsets = [20, 0], sizes = [4, 32], strides = [1, 1]} : vector<32x32xf32> to vector<4x32xf32>
    %156 = vector.extract_strided_slice %154 {offsets = [0, 0], sizes = [4, 32], strides = [1, 1]} : vector<4x48xf32> to vector<4x32xf32>
    %157 = arith.addf %155, %156 : vector<4x32xf32>
    %158 = vector.extract_strided_slice %154 {offsets = [0, 32], sizes = [4, 16], strides = [1, 1]} : vector<4x48xf32> to vector<4x16xf32>
    %159 = vector.broadcast %9 : vector<1x16xf32> to vector<4x16xf32>
    %160 = arith.addf %158, %159 : vector<4x16xf32>
    %161 = arith.negf %157 : vector<4x32xf32>
    %162 = math.exp %161 : vector<4x32xf32>
    %cst_30 = arith.constant 1.000000e+00 : f32
    %163 = vector.broadcast %cst_30 : f32 to vector<4x32xf32>
    %164 = arith.addf %163, %162 : vector<4x32xf32>
    %165 = arith.divf %163, %164 : vector<4x32xf32>
    %166 = vector.extract_strided_slice %165 {offsets = [0, 0], sizes = [4, 16], strides = [1, 1]} : vector<4x32xf32> to vector<4x16xf32>
    %167 = vector.extract_strided_slice %165 {offsets = [0, 16], sizes = [4, 16], strides = [1, 1]} : vector<4x32xf32> to vector<4x16xf32>
    %168 = vector.extract_strided_slice %37 {offsets = [20, 0], sizes = [4, 16], strides = [1, 1]} : vector<32x16xf32> to vector<4x16xf32>
    %169 = arith.mulf %166, %160 : vector<4x16xf32>
    %170 = arith.addf %168, %169 : vector<4x16xf32>
    %171 = math.tanh %170 : vector<4x16xf32>
    %cst_31 = arith.constant 1.000000e+00 : f32
    %172 = vector.broadcast %cst_31 : f32 to vector<4x16xf32>
    %173 = arith.subf %172, %167 : vector<4x16xf32>
    %174 = arith.mulf %173, %171 : vector<4x16xf32>
    %175 = arith.mulf %167, %152 : vector<4x16xf32>
    %176 = arith.addf %174, %175 : vector<4x16xf32>
    %c20 = arith.constant 20 : index
    %c0_32 = arith.constant 0 : index
    %177 = vector.load %arg5[%c20, %c0_32] : memref<32x16xf32, #tpu.memory_space<vmem>>, vector<4x16xf32>
    tpu.vector_store %arg5[%c20, %c0_32], %176 {strides = array<i32>} : memref<32x16xf32, #tpu.memory_space<vmem>>, vector<4x16xf32>,
    %cst_33 = arith.constant dense<0.000000e+00> : vector<4x48xf32>
    %178 = tpu.matmul %176, %2, %cst_33 {dimension_numbers = #tpu.dot_dimension_numbers<[1], [0], [0], [1], [0, 0, 1, 1], [], []>} : vector<4x16xf32>, vector<16x48xf32>, vector<4x48xf32> -> vector<4x48xf32>
    %179 = vector.extract_strided_slice %31 {offsets = [24, 0], sizes = [4, 32], strides = [1, 1]} : vector<32x32xf32> to vector<4x32xf32>
    %180 = vector.extract_strided_slice %178 {offsets = [0, 0], sizes = [4, 32], strides = [1, 1]} : vector<4x48xf32> to vector<4x32xf32>
    %181 = arith.addf %179, %180 : vector<4x32xf32>
    %182 = vector.extract_strided_slice %178 {offsets = [0, 32], sizes = [4, 16], strides = [1, 1]} : vector<4x48xf32> to vector<4x16xf32>
    %183 = vector.broadcast %9 : vector<1x16xf32> to vector<4x16xf32>
    %184 = arith.addf %182, %183 : vector<4x16xf32>
    %185 = arith.negf %181 : vector<4x32xf32>
    %186 = math.exp %185 : vector<4x32xf32>
    %cst_34 = arith.constant 1.000000e+00 : f32
    %187 = vector.broadcast %cst_34 : f32 to vector<4x32xf32>
    %188 = arith.addf %187, %186 : vector<4x32xf32>
    %189 = arith.divf %187, %188 : vector<4x32xf32>
    %190 = vector.extract_strided_slice %189 {offsets = [0, 0], sizes = [4, 16], strides = [1, 1]} : vector<4x32xf32> to vector<4x16xf32>
    %191 = vector.extract_strided_slice %189 {offsets = [0, 16], sizes = [4, 16], strides = [1, 1]} : vector<4x32xf32> to vector<4x16xf32>
    %192 = vector.extract_strided_slice %37 {offsets = [24, 0], sizes = [4, 16], strides = [1, 1]} : vector<32x16xf32> to vector<4x16xf32>
    %193 = arith.mulf %190, %184 : vector<4x16xf32>
    %194 = arith.addf %192, %193 : vector<4x16xf32>
    %195 = math.tanh %194 : vector<4x16xf32>
    %cst_35 = arith.constant 1.000000e+00 : f32
    %196 = vector.broadcast %cst_35 : f32 to vector<4x16xf32>
    %197 = arith.subf %196, %191 : vector<4x16xf32>
    %198 = arith.mulf %197, %195 : vector<4x16xf32>
    %199 = arith.mulf %191, %176 : vector<4x16xf32>
    %200 = arith.addf %198, %199 : vector<4x16xf32>
    %c24 = arith.constant 24 : index
    %c0_36 = arith.constant 0 : index
    %201 = vector.load %arg5[%c24, %c0_36] : memref<32x16xf32, #tpu.memory_space<vmem>>, vector<4x16xf32>
    tpu.vector_store %arg5[%c24, %c0_36], %200 {strides = array<i32>} : memref<32x16xf32, #tpu.memory_space<vmem>>, vector<4x16xf32>,
    %cst_37 = arith.constant dense<0.000000e+00> : vector<4x48xf32>
    %202 = tpu.matmul %200, %2, %cst_37 {dimension_numbers = #tpu.dot_dimension_numbers<[1], [0], [0], [1], [0, 0, 1, 1], [], []>} : vector<4x16xf32>, vector<16x48xf32>, vector<4x48xf32> -> vector<4x48xf32>
    %203 = vector.extract_strided_slice %31 {offsets = [28, 0], sizes = [4, 32], strides = [1, 1]} : vector<32x32xf32> to vector<4x32xf32>
    %204 = vector.extract_strided_slice %202 {offsets = [0, 0], sizes = [4, 32], strides = [1, 1]} : vector<4x48xf32> to vector<4x32xf32>
    %205 = arith.addf %203, %204 : vector<4x32xf32>
    %206 = vector.extract_strided_slice %202 {offsets = [0, 32], sizes = [4, 16], strides = [1, 1]} : vector<4x48xf32> to vector<4x16xf32>
    %207 = vector.broadcast %9 : vector<1x16xf32> to vector<4x16xf32>
    %208 = arith.addf %206, %207 : vector<4x16xf32>
    %209 = arith.negf %205 : vector<4x32xf32>
    %210 = math.exp %209 : vector<4x32xf32>
    %cst_38 = arith.constant 1.000000e+00 : f32
    %211 = vector.broadcast %cst_38 : f32 to vector<4x32xf32>
    %212 = arith.addf %211, %210 : vector<4x32xf32>
    %213 = arith.divf %211, %212 : vector<4x32xf32>
    %214 = vector.extract_strided_slice %213 {offsets = [0, 0], sizes = [4, 16], strides = [1, 1]} : vector<4x32xf32> to vector<4x16xf32>
    %215 = vector.extract_strided_slice %213 {offsets = [0, 16], sizes = [4, 16], strides = [1, 1]} : vector<4x32xf32> to vector<4x16xf32>
    %216 = vector.extract_strided_slice %37 {offsets = [28, 0], sizes = [4, 16], strides = [1, 1]} : vector<32x16xf32> to vector<4x16xf32>
    %217 = arith.mulf %214, %208 : vector<4x16xf32>
    %218 = arith.addf %216, %217 : vector<4x16xf32>
    %219 = math.tanh %218 : vector<4x16xf32>
    %cst_39 = arith.constant 1.000000e+00 : f32
    %220 = vector.broadcast %cst_39 : f32 to vector<4x16xf32>
    %221 = arith.subf %220, %215 : vector<4x16xf32>
    %222 = arith.mulf %221, %219 : vector<4x16xf32>
    %223 = arith.mulf %215, %200 : vector<4x16xf32>
    %224 = arith.addf %222, %223 : vector<4x16xf32>
    %c28 = arith.constant 28 : index
    %c0_40 = arith.constant 0 : index
    %225 = vector.load %arg5[%c28, %c0_40] : memref<32x16xf32, #tpu.memory_space<vmem>>, vector<4x16xf32>
    tpu.vector_store %arg5[%c28, %c0_40], %224 {strides = array<i32>} : memref<32x16xf32, #tpu.memory_space<vmem>>, vector<4x16xf32>,
    %c0_41 = arith.constant 0 : index
    %c0_42 = arith.constant 0 : index
    %c0_43 = arith.constant 0 : index
    %226 = vector.load %arg6[%c0_41, %c0_42, %c0_43] : memref<1x4x16xf32, #tpu.memory_space<vmem>>, vector<1x4x16xf32>
    %227 = vector.shape_cast %226 : vector<1x4x16xf32> to vector<4x16xf32>
    %228 = vector.shape_cast %224 : vector<4x16xf32> to vector<1x4x16xf32>
    tpu.vector_store %arg6[%c0_41, %c0_42, %c0_43], %228 {strides = array<i32>} : memref<1x4x16xf32, #tpu.memory_space<vmem>>, vector<1x4x16xf32>,
    return
  }
}

</mosaic_0001>

<bundles_post_ra>
// kernel: gru_encoder_forward.1
= control target key start
LH: loop header
LB: loop body
LE: loop exit
PB: predicated region body
PF: predicated region fallthrough
CT: control target
= control target key end

     0   :  { %12 = vsyncpa [#allocation3], 0  ;;  %v822_v1 = vmov 0   ;;  %v823_v3 = vmov 1   ;;  %s1024_s0 = inlined_call_operand.vmem [shape: f32[32,2], index: 0, kind: input, shape index: {}]   ;;  %s1025_s1 = inlined_call_operand.vmem [shape: f32[2,48], index: 1, kind: input, shape index: {}]   ;;  %s1026_s2 = inlined_call_operand.vmem [shape: f32[16,48], index: 2, kind: input, shape index: {}]   ;;  %s1027_s3 = inlined_call_operand.vmem [shape: f32[1,48], index: 3, kind: input, shape index: {}]   ;;  %s1028_s4 = inlined_call_operand.vmem [shape: f32[1,48], index: 4, kind: input, shape index: {}]   ;;  %s1029_s5 = inlined_call_operand.hbm [shape: f32[32,16], index: 5, kind: output, shape index: {0}]   ;;  %s1030_s6 = inlined_call_operand.hbm [shape: f32[1,4,16], index: 6, kind: output, shape index: {1}]  }
   0x1   :  { %v24_v0 = vld [vmem:[%s1024_s0] sm:$0xff]  ;;  %714 = vset.pattern.permute.xlu0 %v822_v1  ;;  %716 = vset.pattern.permute.xlu2 %v822_v1 }
   0x2   :  { %v873_v2 = vld [vmem:[%s1028_s4] ss:$0 sm:$0xff]  ;;  %36 = vperm.xlu0 %714, %v24_v0   ;;  %718 = vset.pattern.permute.xlu1 %v823_v3 }
   0x3   :  { %13 = vsyncpa [#allocation5], 0  ;;  %s824_s25 = smov 96   ;;  %v32_v4 = vld [vmem:[%s1028_s4] sm:$0x1]  ;;  %v30_v38 = vld [vmem:[%s1026_s2 + $0x8] sm:$0xff] }
   0x4   :  { %124 = vrot.lane.b32.xlu1 %v873_v2, %s824_s25  ;;  %v28_v5 = vld [vmem:[%s1025_s1] sm:$0x3]  ;;  %s825_s1 = smov 32   ;;  %165 = vmatpush.msra.mxu0 %v30_v38  ;;  %vm146_vm4 = vcmask 125952   ;;  %vm148_vm5 = vcmask 130048   ;;  %s662_s21 = sshll.u32 %s1029_s5, 4  ;;  %s663_s21 = int_to_ptr.hbm [resolvable:$true] %s662_s21 }
   0x5   :  { %v31_v6 = vld [vmem:[%s1027_s3] sm:$0x1]  ;;  %v889_v9 = vperm.slane %v28_v5, 0  ;;  %v899_v13 = vperm.slane %v28_v5, 1  ;;  %242 = vmatpush.msra.mxu1 %v30_v38  ;;  %310 = vmatpush.msra.mxu2 %v30_v38  ;;  %v25_v5 = vld [vmem:[%s1024_s0 + $0x8] sm:$0xff]  ;;  %s828_s22 = smov [#allocation4]  }
   0x6   :  { %v33_v8 = vadd.f32 %v32_v4, %v31_v6  ;;  %v896_v11 = vld [vmem:[%s1027_s3] ss:$0 sm:$0xff]  ;;  %s826_s3 = smov 112   ;;  %386 = vmatpush.msra.mxu3 %v30_v38  ;;  %s674_s23 = sshll.u32 %s828_s22, 4  ;;  %s675_s23 = int_to_ptr.vmem [resolvable:$true] %s674_s23 }
   0x7   :  { %v29_v39 = vld [vmem:[%s1026_s2] sm:$0xff]  ;;  %s676_s26 = sshll.u32 %s1030_s6, 4  ;;  %s829_s27 = smov 128   ;;  %s677_s26 = int_to_ptr.hbm [resolvable:$true] %s676_s26 }
   0x8   :  { %v891_v10 = vperm.slane %v33_v8, 0  ;;  %166 = vmatpush.msra.mxu0 %v29_v39  ;;  %243 = vmatpush.msra.mxu1 %v29_v39  ;;  %s830_s28 = smov 8  }
   0x9   :  { %311 = vmatpush.msra.mxu2 %v29_v39  ;;  %387 = vmatpush.msra.mxu3 %v29_v39 }
   0xa   :  { %715 = vset.pattern.permute.xlu0 %v823_v3  ;;  %454 = vmatpush.msrb.mxu0 %v30_v38 }
   0xb   :  { %74 = vperm.xlu0 %715, %v24_v0   ;;  %530 = vmatpush.msrb.mxu1 %v30_v38 }
   0xc   :  { %598 = vmatpush.msrb.mxu2 %v30_v38  ;;  %455 = vmatpush.msrb.mxu0 %v29_v39 }
   0xd   :  { %531 = vmatpush.msrb.mxu1 %v29_v39 }
   0xe   :  { %599 = vmatpush.msrb.mxu2 %v29_v39 }
  0x74   :  { %v37_v7 = vpop.permute.xlu0 %36 }
  0x75   :  { %v55_v12 = vmul.f32 %v889_v9, %v37_v7 }
  0x76   :  { %v125_v30 = vpop.permute.xlu1 %124 }
  0x77   :  { %v62_v15 = vadd.f32 %v891_v10, %v55_v12  ;;  %v69_v16 = vadd.f32 %v896_v11, %v55_v12 }
  0x7d   :  { %v75_v14 = vpop.permute.xlu0 %74 }
  0x7e   :  { %v90_v17 = vmul.f32 %v899_v13, %v75_v14 }
  0x80   :  { %v904_v18 = vadd.f32 %v90_v17, %v62_v15  ;;  %v906_v19 = vadd.f32 %v90_v17, %v69_v16 }
  0x82   :  { %v690_v20 = vmul.f32 -1.442695, %v904_v18 }
  0x84   :  { %722 = vpow2.f32 %v690_v20 }
  0x8a   :  { %v723_v21 = vpop.eup %722 }
  0x8b   :  { %v105_v22 = vadd.f32 1.0, %v723_v21 }
  0x8d   :  { %724 = vrcp.f32 %v105_v22  ;;  %v117_v26 = vand.u32 2147483648, %v105_v22  ;;  %v115_v28 = vand.u32 2147483647, %v105_v22  ;;  %vm111_vm1 = vweird.f32 %v105_v22 }
  0x8f   :  { %v118_v31 = vor.u32 1.1754944e-38, %v117_v26  ;;  %vm116_vm3 = vcmp.eq.f32.partialorder %v115_v28, 8.507059e+37 }
  0x93   :  { %v725_v23 = vpop.eup %724 }
  0x94   :  { %v107_v24 = vmul.f32 %v725_v23, %v105_v22  ;;  %vm112_vm0 = vweird.f32 %v725_v23 }
  0x95   :  { %vm113_vm2 = vmor %vm111_vm1, %vm112_vm0 }
  0x96   :  { %v108_v25 = vsub.f32 1.0, %v107_v24 }
  0x98   :  { %v109_v27 = vmul.f32 %v725_v23, %v108_v25 }
  0x9a   :  { %v110_v29 = vadd.f32 %v725_v23, %v109_v27 }
  0x9c   :  { %v114_v32 = vsel %vm113_vm2, %v725_v23, %v110_v29 }
  0x9d   :  { %v119_v33 = vsel %vm116_vm3, %v118_v31, %v114_v32 }
  0x9e   :  { %v127_v34 = vmul.f32 %v125_v30, %v119_v33  ;;  %v134_v40 = vsub.f32 1.0, %v119_v33  ;;  %v140_v42 = vmul.f32 0.0, %v119_v33 }
  0xa0   :  { %129 = vrot.lane.b32.xlu1 %v127_v34, %s825_s1 }
 0x112   :  { %v130_v35 = vpop.permute.xlu1 %129 }
 0x113   :  { %v132_v36 = vadd.f32 %v130_v35, %v906_v19 }
 0x115   :  { %726 = vtanh.f32 %v132_v36 }
 0x11b   :  { %v727_v37 = vpop.eup %726 }
 0x11c   :  { %136 = vrot.lane.b32.xlu2 %v727_v37, %s826_s3 }
 0x176   :  { %v137_v41 = vpop.permute.xlu2 %136 }
 0x177   :  { %v139_v43 = vmul.f32 %v137_v41, %v134_v40 }
 0x179   :  { %v141_v44 = vadd.f32 %v140_v42, %v139_v43 }
 0x17b   :  { %143 = vrot.lane.b32.xlu2 %v141_v44, %s826_s3  ;;  %v213_v12 = vrot.slane %v141_v44, 4 }
 0x1d5   :  { %v144_v45 = vpop.permute.xlu2 %143 }
 0x1d6   :  { %147 = vst.msk [vmem:[#allocation2] sm:$0xf] %vm146_vm4, %v144_v45  ;;  %691 = vmatmul.msk.f32.vlgmr.msra.gmra.mxu0 %vm148_vm5, %v144_v45 }
 0x253   :  { %v168_v46 = vpop.f32.mrf.mxu0 }
 0x254   :  { %v175_v47 = vadd.f32 %v873_v2, %v168_v46  ;;  %v172_v49 = vrot.slane %v168_v46, 4 }
 0x256   :  { %v196_v48 = vrot.slane %v175_v47, 4  ;;  %v174_v50 = vadd.f32 %v172_v49, %v904_v18 }
 0x258   :  { %197 = vrot.lane.b32.xlu1 %v196_v48, %s824_s25  ;;  %v692_v51 = vmul.f32 -1.442695, %v174_v50 }
 0x25a   :  { %728 = vpow2.f32 %v692_v51 }
 0x260   :  { %v729_v52 = vpop.eup %728 }
 0x261   :  { %v179_v53 = vadd.f32 1.0, %v729_v52 }
 0x263   :  { %730 = vrcp.f32 %v179_v53  ;;  %v191_v59 = vand.u32 2147483648, %v179_v53  ;;  %vm185_vm7 = vweird.f32 %v179_v53  ;;  %v189_v60 = vand.u32 2147483647, %v179_v53 }
 0x265   :  { %v192_v62 = vor.u32 1.1754944e-38, %v191_v59  ;;  %vm190_vm9 = vcmp.eq.f32.partialorder %v189_v60, 8.507059e+37 }
 0x269   :  { %v731_v54 = vpop.eup %730 }
 0x26a   :  { %v181_v55 = vmul.f32 %v731_v54, %v179_v53  ;;  %vm186_vm6 = vweird.f32 %v731_v54 }
 0x26b   :  { %vm187_vm8 = vmor %vm185_vm7, %vm186_vm6 }
 0x26c   :  { %v182_v56 = vsub.f32 1.0, %v181_v55 }
 0x26e   :  { %v183_v57 = vmul.f32 %v731_v54, %v182_v56 }
 0x270   :  { %v184_v58 = vadd.f32 %v731_v54, %v183_v57 }
 0x272   :  { %v188_v61 = vsel %vm187_vm8, %v731_v54, %v184_v58 }
 0x273   :  { %v193_v0 = vsel %vm190_vm9, %v192_v62, %v188_v61 }
 0x274   :  { %v207_v14 = vsub.f32 1.0, %v193_v0  ;;  %v215_v18 = vmul.f32 %v213_v12, %v193_v0 }
 0x2ca   :  { %v198_v63 = vpop.permute.xlu1 %197 }
 0x2cb   :  { %v200_v4 = vmul.f32 %v198_v63, %v193_v0 }
 0x2cd   :  { %202 = vrot.lane.b32.xlu2 %v200_v4, %s825_s1 }
 0x2d5   :  { %41 = vperm.xlu2 %716, %v25_v5  }
 0x327   :  { %v203_v6 = vpop.permute.xlu2 %202 }
 0x328   :  { %v205_v7 = vadd.f32 %v203_v6, %v906_v19 }
 0x32a   :  { %732 = vtanh.f32 %v205_v7 }
 0x32f   :  { %v42_v16 = vpop.permute.xlu2 %41 }
 0x330   :  { %v733_v8 = vpop.eup %732  ;;  %v56_v21 = vmul.f32 %v889_v9, %v42_v16 }
 0x331   :  { %209 = vrot.lane.b32.xlu0 %v733_v8, %s826_s3 }
 0x332   :  { %v70_v19 = vadd.f32 %v896_v11, %v56_v21  ;;  %v63_v28 = vadd.f32 %v891_v10, %v56_v21 }
 0x339   :  { %78 = vperm.xlu0 %715, %v25_v5  }
 0x341   :  { %717 = vset.pattern.permute.xlu0 %v822_v1 }
 0x3a3   :  { %v210_v15 = vpop.permute.xlu0 %209 }
 0x3a4   :  { %v212_v17 = vmul.f32 %v210_v15, %v207_v14 }
 0x3a6   :  { %v931_v20 = vadd.f32 %v215_v18, %v212_v17 }
 0x3a8   :  { %v223_v22 = vrot.slane %v931_v20, 4 }
 0x3aa   :  { %224 = vrot.lane.b32.xlu1 %v223_v22, %s826_s3 }
 0x3ab   :  { %v79_v23 = vpop.permute.xlu0 %78 }
 0x3ac   :  { %v91_v24 = vmul.f32 %v899_v13, %v79_v23 }
 0x3ae   :  { %v938_v1 = vadd.f32 %v91_v24, %v70_v19  ;;  %v95_v29 = vadd.f32 %v91_v24, %v63_v28 }
 0x41c   :  { %v225_v25 = vpop.permute.xlu1 %224 }
 0x41d   :  { %693 = vmatmul.msk.f32.vlgmr.msra.gmra.mxu1 %vm148_vm5, %v225_v25 }
 0x49a   :  { %v245_v26 = vpop.f32.mrf.mxu1 }
 0x49b   :  { %v249_v27 = vadd.f32 %v873_v2, %v245_v26  ;;  %v248_v30 = vadd.f32 %v245_v26, %v95_v29 }
 0x49d   :  { %270 = vrot.lane.b32.xlu1 %v249_v27, %s824_s25  ;;  %v694_v31 = vmul.f32 -1.442695, %v248_v30 }
 0x49f   :  { %734 = vpow2.f32 %v694_v31 }
 0x4a5   :  { %v735_v32 = vpop.eup %734 }
 0x4a6   :  { %v253_v33 = vadd.f32 1.0, %v735_v32 }
 0x4a8   :  { %736 = vrcp.f32 %v253_v33  ;;  %v265_v39 = vand.u32 2147483648, %v253_v33  ;;  %vm259_vm11 = vweird.f32 %v253_v33  ;;  %v263_v40 = vand.u32 2147483647, %v253_v33 }
 0x4aa   :  { %v266_v42 = vor.u32 1.1754944e-38, %v265_v39  ;;  %vm264_vm13 = vcmp.eq.f32.partialorder %v263_v40, 8.507059e+37 }
 0x4ae   :  { %v737_v34 = vpop.eup %736 }
 0x4af   :  { %v255_v35 = vmul.f32 %v737_v34, %v253_v33  ;;  %vm260_vm10 = vweird.f32 %v737_v34 }
 0x4b0   :  { %vm261_vm12 = vmor %vm259_vm11, %vm260_vm10 }
 0x4b1   :  { %v256_v36 = vsub.f32 1.0, %v255_v35 }
 0x4b3   :  { %v257_v37 = vmul.f32 %v737_v34, %v256_v36 }
 0x4b5   :  { %v258_v38 = vadd.f32 %v737_v34, %v257_v37 }
 0x4b7   :  { %v262_v41 = vsel %vm261_vm12, %v737_v34, %v258_v38 }
 0x4b8   :  { %v267_v44 = vsel %vm264_vm13, %v266_v42, %v262_v41 }
 0x4b9   :  { %v280_v49 = vsub.f32 1.0, %v267_v44  ;;  %v287_v51 = vmul.f32 %v267_v44, %v223_v22 }
 0x50f   :  { %v271_v43 = vpop.permute.xlu1 %270 }
 0x510   :  { %v273_v45 = vmul.f32 %v271_v43, %v267_v44 }
 0x512   :  { %275 = vrot.lane.b32.xlu2 %v273_v45, %s825_s1 }
 0x56c   :  { %v276_v46 = vpop.permute.xlu2 %275 }
 0x56d   :  { %v278_v47 = vadd.f32 %v276_v46, %v938_v1 }
 0x56f   :  { %738 = vtanh.f32 %v278_v47 }
 0x575   :  { %v739_v48 = vpop.eup %738 }
 0x576   :  { %282 = vrot.lane.b32.xlu0 %v739_v48, %s826_s3 }
 0x5e8   :  { %v283_v50 = vpop.permute.xlu0 %282 }
 0x5e9   :  { %v285_v52 = vmul.f32 %v283_v50, %v280_v49 }
 0x5eb   :  { %v288_v53 = vadd.f32 %v287_v51, %v285_v52 }
 0x5ed   :  { %290 = vrot.lane.b32.xlu1 %v288_v53, %s826_s3  ;;  %v358_v14 = vrot.slane %v288_v53, 4 }
 0x65f   :  { %v291_v54 = vpop.permute.xlu1 %290 }
 0x660   :  { %293 = vst.msk [vmem:[#allocation2 + $0x8] sm:$0xf] %vm146_vm4, %v291_v54  ;;  %695 = vmatmul.msk.f32.vlgmr.msra.gmra.mxu2 %vm148_vm5, %v291_v54 }
 0x6e3   :  { %v313_v55 = vpop.f32.mrf.mxu2 }
 0x6e4   :  { %v317_v56 = vrot.slane %v313_v55, 4  ;;  %v320_v57 = vadd.f32 %v873_v2, %v313_v55 }
 0x6e6   :  { %v319_v58 = vadd.f32 %v317_v56, %v95_v29  ;;  %v341_v59 = vrot.slane %v320_v57, 4  ;;  %v26_v29 = vld [vmem:[%s1024_s0 + $0x10] sm:$0xff] }
 0x6e8   :  { %v696_v60 = vmul.f32 -1.442695, %v319_v58  ;;  %342 = vrot.lane.b32.xlu2 %v341_v59, %s824_s25 }
 0x6ea   :  { %740 = vpow2.f32 %v696_v60 }
 0x6f0   :  { %v741_v61 = vpop.eup %740 }
 0x6f1   :  { %v324_v62 = vadd.f32 1.0, %v741_v61 }
 0x6f3   :  { %742 = vrcp.f32 %v324_v62  ;;  %v336_v5 = vand.u32 2147483648, %v324_v62  ;;  %v334_v7 = vand.u32 2147483647, %v324_v62  ;;  %vm330_vm15 = vweird.f32 %v324_v62 }
 0x6f5   :  { %v337_v12 = vor.u32 1.1754944e-38, %v336_v5  ;;  %vm335_vm1 = vcmp.eq.f32.partialorder %v334_v7, 8.507059e+37 }
 0x6f9   :  { %v743_v63 = vpop.eup %742 }
 0x6fa   :  { %v326_v0 = vmul.f32 %v743_v63, %v324_v62  ;;  %vm331_vm14 = vweird.f32 %v743_v63 }
 0x6fb   :  { %vm332_vm0 = vmor %vm330_vm15, %vm331_vm14 }
 0x6fc   :  { %v327_v4 = vsub.f32 1.0, %v326_v0 }
 0x6fe   :  { %v328_v6 = vmul.f32 %v743_v63, %v327_v4 }
 0x700   :  { %v329_v8 = vadd.f32 %v743_v63, %v328_v6 }
 0x702   :  { %v333_v15 = vsel %vm332_vm0, %v743_v63, %v329_v8 }
 0x703   :  { %v338_v16 = vsel %vm335_vm1, %v337_v12, %v333_v15 }
 0x704   :  { %v360_v17 = vmul.f32 %v358_v14, %v338_v16  ;;  %v352_v24 = vsub.f32 1.0, %v338_v16 }
 0x742   :  { %v343_v18 = vpop.permute.xlu2 %342 }
 0x743   :  { %v345_v21 = vmul.f32 %v343_v18, %v338_v16 }
 0x745   :  { %347 = vrot.lane.b32.xlu0 %v345_v21, %s825_s1 }
 0x74d   :  { %46 = vperm.xlu0 %717, %v26_v29  }
 0x755   :  { %719 = vset.pattern.permute.xlu0 %v823_v3 }
 0x7b7   :  { %v348_v22 = vpop.permute.xlu0 %347 }
 0x7b8   :  { %v350_v19 = vadd.f32 %v348_v22, %v938_v1 }
 0x7ba   :  { %744 = vtanh.f32 %v350_v19 }
 0x7bf   :  { %v47_v32 = vpop.permute.xlu0 %46 }
 0x7c0   :  { %v745_v23 = vpop.eup %744  ;;  %v57_v33 = vmul.f32 %v889_v9, %v47_v32 }
 0x7c1   :  { %354 = vrot.lane.b32.xlu1 %v745_v23, %s826_s3 }
 0x7c2   :  { %v64_v35 = vadd.f32 %v891_v10, %v57_v33  ;;  %v71_v53 = vadd.f32 %v896_v11, %v57_v33 }
 0x7c9   :  { %82 = vperm.xlu1 %718, %v26_v29   ;;  %v27_v29 = vld [vmem:[%s1024_s0 + $0x18] sm:$0xff]  ;;  %s827_s0 = smov [#allocation2]  }
 0x7ca   :  { %s660_s18 = sshll.u32 %s827_s0, 4  ;;  %s661_s18 = int_to_ptr.vmem [resolvable:$true] %s660_s18 }
 0x833   :  { %v355_v25 = vpop.permute.xlu1 %354 }
 0x834   :  { %v357_v26 = vmul.f32 %v355_v25, %v352_v24 }
 0x836   :  { %v955_v27 = vadd.f32 %v360_v17, %v357_v26 }
 0x838   :  { %v367_v28 = vrot.slane %v955_v27, 4 }
 0x83a   :  { %368 = vrot.lane.b32.xlu2 %v367_v28, %s826_s3 }
 0x83b   :  { %v83_v34 = vpop.permute.xlu1 %82 }
 0x83c   :  { %v92_v36 = vmul.f32 %v899_v13, %v83_v34 }
 0x83e   :  { %v96_v37 = vadd.f32 %v92_v36, %v64_v35  ;;  %v100_v54 = vadd.f32 %v92_v36, %v71_v53 }
 0x894   :  { %v369_v1 = vpop.permute.xlu2 %368 }
 0x895   :  { %697 = vmatmul.msk.f32.vlgmr.msra.gmra.mxu3 %vm148_vm5, %v369_v1 }
 0x918   :  { %v389_v30 = vpop.f32.mrf.mxu3 }
 0x919   :  { %v393_v31 = vadd.f32 %v873_v2, %v389_v30  ;;  %v392_v38 = vadd.f32 %v389_v30, %v96_v37 }
 0x91b   :  { %414 = vrot.lane.b32.xlu2 %v393_v31, %s824_s25  ;;  %v698_v39 = vmul.f32 -1.442695, %v392_v38 }
 0x91d   :  { %746 = vpow2.f32 %v698_v39 }
 0x923   :  { %v747_v3 = vpop.eup %746 }
 0x924   :  { %v397_v40 = vadd.f32 1.0, %v747_v3 }
 0x926   :  { %748 = vrcp.f32 %v397_v40  ;;  %v409_v46 = vand.u32 2147483648, %v397_v40  ;;  %vm403_vm3 = vweird.f32 %v397_v40  ;;  %v407_v47 = vand.u32 2147483647, %v397_v40 }
 0x928   :  { %v410_v49 = vor.u32 1.1754944e-38, %v409_v46  ;;  %vm408_vm7 = vcmp.eq.f32.partialorder %v407_v47, 8.507059e+37 }
 0x92c   :  { %v749_v41 = vpop.eup %748 }
 0x92d   :  { %v399_v42 = vmul.f32 %v749_v41, %v397_v40  ;;  %vm404_vm2 = vweird.f32 %v749_v41 }
 0x92e   :  { %vm405_vm6 = vmor %vm403_vm3, %vm404_vm2  ;;  %vm221_vm2 = vcmask 130052  }
 0x92f   :  { %v400_v43 = vsub.f32 1.0, %v399_v42 }
 0x931   :  { %v401_v44 = vmul.f32 %v749_v41, %v400_v43 }
 0x933   :  { %v402_v45 = vadd.f32 %v749_v41, %v401_v44 }
 0x935   :  { %v406_v48 = vsel %vm405_vm6, %v749_v41, %v402_v45 }
 0x936   :  { %v411_v51 = vsel %vm408_vm7, %v410_v49, %v406_v48 }
 0x937   :  { %v424_v58 = vsub.f32 1.0, %v411_v51  ;;  %v431_v60 = vmul.f32 %v411_v51, %v367_v28 }
 0x975   :  { %v415_v50 = vpop.permute.xlu2 %414 }
 0x976   :  { %v417_v52 = vmul.f32 %v415_v50, %v411_v51 }
 0x978   :  { %419 = vrot.lane.b32.xlu1 %v417_v52, %s825_s1 }
 0x9ea   :  { %v420_v55 = vpop.permute.xlu1 %419 }
 0x9eb   :  { %v422_v56 = vadd.f32 %v420_v55, %v100_v54 }
 0x9ed   :  { %750 = vtanh.f32 %v422_v56 }
 0x9f3   :  { %v751_v57 = vpop.eup %750 }
 0x9f4   :  { %426 = vrot.lane.b32.xlu2 %v751_v57, %s826_s3 }
 0xa4e   :  { %v427_v59 = vpop.permute.xlu2 %426 }
 0xa4f   :  { %v429_v61 = vmul.f32 %v427_v59, %v424_v58 }
 0xa51   :  { %v432_v62 = vadd.f32 %v431_v60, %v429_v61 }
 0xa53   :  { %434 = vrot.lane.b32.xlu0 %v432_v62, %s826_s3  ;;  %v502_v32 = vrot.slane %v432_v62, 4 }
 0xac5   :  { %v435_v63 = vpop.permute.xlu0 %434 }
 0xac6   :  { %437 = vst.msk [vmem:[#allocation2 + $0x10] sm:$0xf] %vm146_vm4, %v435_v63  ;;  %699 = vmatmul.msk.f32.vlgmr.msrb.gmra.mxu0 %vm148_vm5, %v435_v63 }
 0xb43   :  { %v457_v0 = vpop.f32.mrf.mxu0 }
 0xb44   :  { %v464_v4 = vadd.f32 %v873_v2, %v457_v0  ;;  %v461_v6 = vrot.slane %v457_v0, 4 }
 0xb46   :  { %v485_v5 = vrot.slane %v464_v4, 4  ;;  %v463_v7 = vadd.f32 %v461_v6, %v96_v37 }
 0xb48   :  { %486 = vrot.lane.b32.xlu1 %v485_v5, %s824_s25  ;;  %v700_v8 = vmul.f32 -1.442695, %v463_v7 }
 0xb4a   :  { %752 = vpow2.f32 %v700_v8 }
 0xb50   :  { %v753_v12 = vpop.eup %752 }
 0xb51   :  { %v468_v14 = vadd.f32 1.0, %v753_v12 }
 0xb53   :  { %754 = vrcp.f32 %v468_v14  ;;  %v480_v22 = vand.u32 2147483648, %v468_v14  ;;  %vm474_vm9 = vweird.f32 %v468_v14  ;;  %v478_v19 = vand.u32 2147483647, %v468_v14 }
 0xb55   :  { %v481_v24 = vor.u32 1.1754944e-38, %v480_v22  ;;  %vm479_vm11 = vcmp.eq.f32.partialorder %v478_v19, 8.507059e+37 }
 0xb59   :  { %v755_v15 = vpop.eup %754 }
 0xb5a   :  { %v470_v16 = vmul.f32 %v755_v15, %v468_v14  ;;  %vm475_vm8 = vweird.f32 %v755_v15 }
 0xb5b   :  { %vm476_vm10 = vmor %vm474_vm9, %vm475_vm8 }
 0xb5c   :  { %v471_v17 = vsub.f32 1.0, %v470_v16 }
 0xb5e   :  { %v472_v18 = vmul.f32 %v755_v15, %v471_v17 }
 0xb60   :  { %v473_v21 = vadd.f32 %v755_v15, %v472_v18 }
 0xb62   :  { %v477_v23 = vsel %vm476_vm10, %v755_v15, %v473_v21 }
 0xb63   :  { %v482_v26 = vsel %vm479_vm11, %v481_v24, %v477_v23 }
 0xb64   :  { %v496_v33 = vsub.f32 1.0, %v482_v26  ;;  %v504_v36 = vmul.f32 %v502_v32, %v482_v26 }
 0xbba   :  { %v487_v25 = vpop.permute.xlu1 %486 }
 0xbbb   :  { %v489_v28 = vmul.f32 %v487_v25, %v482_v26 }
 0xbbd   :  { %491 = vrot.lane.b32.xlu2 %v489_v28, %s825_s1 }
 0xbc5   :  { %51 = vperm.xlu2 %716, %v27_v29  }
 0xc17   :  { %v492_v1 = vpop.permute.xlu2 %491 }
 0xc18   :  { %v494_v30 = vadd.f32 %v492_v1, %v100_v54 }
 0xc1a   :  { %756 = vtanh.f32 %v494_v30 }
 0xc1f   :  { %v52_v37 = vpop.permute.xlu2 %51 }
 0xc20   :  { %v757_v31 = vpop.eup %756  ;;  %v58_v39 = vmul.f32 %v889_v9, %v52_v37 }
 0xc21   :  { %498 = vrot.lane.b32.xlu0 %v757_v31, %s826_s3 }
 0xc22   :  { %v72_v41 = vadd.f32 %v896_v11, %v58_v39  ;;  %v65_v9 = vadd.f32 %v891_v10, %v58_v39 }
 0xc29   :  { %86 = vperm.xlu0 %719, %v27_v29  }
 0xc93   :  { %v499_v34 = vpop.permute.xlu0 %498 }
 0xc94   :  { %v501_v35 = vmul.f32 %v499_v34, %v496_v33 }
 0xc96   :  { %v982_v38 = vadd.f32 %v504_v36, %v501_v35 }
 0xc98   :  { %v511_v3 = vrot.slane %v982_v38, 4 }
 0xc9a   :  { %512 = vrot.lane.b32.xlu1 %v511_v3, %s826_s3 }
 0xc9b   :  { %v87_v40 = vpop.permute.xlu0 %86 }
 0xc9c   :  { %v93_v42 = vmul.f32 %v899_v13, %v87_v40 }
 0xc9e   :  { %v989_v43 = vadd.f32 %v93_v42, %v72_v41  ;;  %v97_v47 = vadd.f32 %v93_v42, %v65_v9 }
 0xd0c   :  { %v513_v44 = vpop.permute.xlu1 %512 }
 0xd0d   :  { %701 = vmatmul.msk.f32.vlgmr.msrb.gmra.mxu1 %vm148_vm5, %v513_v44 }
 0xd8a   :  { %v533_v45 = vpop.f32.mrf.mxu1 }
 0xd8b   :  { %v537_v46 = vadd.f32 %v873_v2, %v533_v45  ;;  %v536_v48 = vadd.f32 %v533_v45, %v97_v47 }
 0xd8d   :  { %558 = vrot.lane.b32.xlu1 %v537_v46, %s824_s25  ;;  %v702_v49 = vmul.f32 -1.442695, %v536_v48 }
 0xd8f   :  { %758 = vpow2.f32 %v702_v49 }
 0xd95   :  { %v759_v50 = vpop.eup %758 }
 0xd96   :  { %v541_v11 = vadd.f32 1.0, %v759_v50 }
 0xd98   :  { %760 = vrcp.f32 %v541_v11  ;;  %v553_v55 = vand.u32 2147483648, %v541_v11  ;;  %vm547_vm13 = vweird.f32 %v541_v11  ;;  %v551_v56 = vand.u32 2147483647, %v541_v11 }
 0xd9a   :  { %v554_v58 = vor.u32 1.1754944e-38, %v553_v55  ;;  %vm552_vm15 = vcmp.eq.f32.partialorder %v551_v56, 8.507059e+37 }
 0xd9e   :  { %v761_v13 = vpop.eup %760 }
 0xd9f   :  { %v543_v51 = vmul.f32 %v761_v13, %v541_v11  ;;  %vm548_vm12 = vweird.f32 %v761_v13 }
 0xda0   :  { %vm549_vm14 = vmor %vm547_vm13, %vm548_vm12 }
 0xda1   :  { %v544_v52 = vsub.f32 1.0, %v543_v51 }
 0xda3   :  { %v545_v53 = vmul.f32 %v761_v13, %v544_v52 }
 0xda5   :  { %v546_v54 = vadd.f32 %v761_v13, %v545_v53 }
 0xda7   :  { %v550_v57 = vsel %vm549_vm14, %v761_v13, %v546_v54 }
 0xda8   :  { %v555_v59 = vsel %vm552_vm15, %v554_v58, %v550_v57 }
 0xda9   :  { %v568_v0 = vsub.f32 1.0, %v555_v59  ;;  %v575_v5 = vmul.f32 %v555_v59, %v511_v3 }
 0xdff   :  { %v559_v10 = vpop.permute.xlu1 %558 }
 0xe00   :  { %v561_v60 = vmul.f32 %v559_v10, %v555_v59 }
 0xe02   :  { %563 = vrot.lane.b32.xlu2 %v561_v60, %s825_s1 }
 0xe5c   :  { %v564_v61 = vpop.permute.xlu2 %563 }
 0xe5d   :  { %v566_v62 = vadd.f32 %v564_v61, %v989_v43 }
 0xe5f   :  { %762 = vtanh.f32 %v566_v62 }
 0xe65   :  { %v763_v63 = vpop.eup %762 }
 0xe66   :  { %570 = vrot.lane.b32.xlu1 %v763_v63, %s826_s3 }
 0xed8   :  { %v571_v4 = vpop.permute.xlu1 %570 }
 0xed9   :  { %v573_v6 = vmul.f32 %v571_v4, %v568_v0 }
 0xedb   :  { %v576_v7 = vadd.f32 %v575_v5, %v573_v6 }
 0xedd   :  { %578 = vrot.lane.b32.xlu2 %v576_v7, %s826_s3  ;;  %v646_v37 = vrot.slane %v576_v7, 4 }
 0xf37   :  { %v579_v8 = vpop.permute.xlu2 %578 }
 0xf38   :  { %581 = vst.msk [vmem:[#allocation2 + $0x18] sm:$0xf] %vm146_vm4, %v579_v8  ;;  %703 = vmatmul.msk.f32.vlgmr.msrb.gmra.mxu2 %vm148_vm5, %v579_v8 }
 0xfbb   :  { %v601_v12 = vpop.f32.mrf.mxu2 }
 0xfbc   :  { %v608_v14 = vadd.f32 %v873_v2, %v601_v12  ;;  %v605_v16 = vrot.slane %v601_v12, 4 }
 0xfbe   :  { %v629_v15 = vrot.slane %v608_v14, 4  ;;  %v607_v17 = vadd.f32 %v605_v16, %v97_v47 }
 0xfc0   :  { %630 = vrot.lane.b32.xlu0 %v629_v15, %s824_s25  ;;  %v704_v18 = vmul.f32 -1.442695, %v607_v17 }
 0xfc2   :  { %764 = vpow2.f32 %v704_v18 }
 0xfc8   :  { %218 = vrot.lane.b32.xlu0 %v931_v20, %s826_s3  ;;  %v765_v21 = vpop.eup %764 }
 0xfc9   :  { %v612_v22 = vadd.f32 1.0, %v765_v21 }
 0xfcb   :  { %766 = vrcp.f32 %v612_v22  ;;  %v624_v2 = vand.u32 2147483648, %v612_v22  ;;  %vm618_vm5 = vweird.f32 %v612_v22  ;;  %v622_v28 = vand.u32 2147483647, %v612_v22 }
 0xfcd   :  { %v625_v1 = vor.u32 1.1754944e-38, %v624_v2  ;;  %vm623_vm1 = vcmp.eq.f32.partialorder %v622_v28, 8.507059e+37 }
 0xfd1   :  { %v767_v19 = vpop.eup %766 }
 0xfd2   :  { %v614_v23 = vmul.f32 %v767_v19, %v612_v22  ;;  %vm619_vm4 = vweird.f32 %v767_v19 }
 0xfd3   :  { %vm620_vm0 = vmor %vm618_vm5, %vm619_vm4 }
 0xfd4   :  { %v615_v24 = vsub.f32 1.0, %v614_v23 }
 0xfd6   :  { %v616_v25 = vmul.f32 %v767_v19, %v615_v24 }
 0xfd8   :  { %v617_v26 = vadd.f32 %v767_v19, %v616_v25 }
 0xfda   :  { %v621_v29 = vsel %vm620_vm0, %v767_v19, %v617_v26 }
 0xfdb   :  { %v626_v30 = vsel %vm623_vm1, %v625_v1, %v621_v29 }
 0xfdc   :  { %v640_v39 = vsub.f32 1.0, %v626_v30  ;;  %v648_v41 = vmul.f32 %v646_v37, %v626_v30 }
0x1032   :  { %v631_v20 = vpop.permute.xlu0 %630 }
0x1033   :  { %v633_v31 = vmul.f32 %v631_v20, %v626_v30 }
0x1035   :  { %635 = vrot.lane.b32.xlu1 %v633_v31, %s825_s1 }
0x103a   :  { %v219_v32 = vpop.permute.xlu0 %218 }
0x103b   :  { %222 = vst.msk [vmem:[#allocation2] sm:$0xf0] %vm221_vm2, %v219_v32 }
0x103d   :  { %363 = vrot.lane.b32.xlu1 %v955_v27, %s826_s3 }
0x10a7   :  { %v636_v33 = vpop.permute.xlu1 %635 }
0x10a8   :  { %v638_v34 = vadd.f32 %v636_v33, %v989_v43 }
0x10aa   :  { %768 = vtanh.f32 %v638_v34 }
0x10af   :  { %v364_v35 = vpop.permute.xlu1 %363 }
0x10b0   :  { %v769_v36 = vpop.eup %768  ;;  %366 = vst.msk [vmem:[#allocation2 + $0x8] sm:$0xf0] %vm221_vm2, %v364_v35 }
0x10b1   :  { %642 = vrot.lane.b32.xlu2 %v769_v36, %s826_s3 }
0x10b9   :  { %507 = vrot.lane.b32.xlu2 %v982_v38, %s826_s3 }
0x110b   :  { %v643_v3 = vpop.permute.xlu2 %642 }
0x110c   :  { %v645_v40 = vmul.f32 %v643_v3, %v640_v39 }
0x110e   :  { %v649_v42 = vadd.f32 %v648_v41, %v645_v40 }
0x1110   :  { %651 = vrot.lane.b32.xlu0 %v649_v42, %s826_s3 }
0x1113   :  { %v508_v27 = vpop.permute.xlu2 %507 }
0x1114   :  { %510 = vst.msk [vmem:[#allocation2 + $0x10] sm:$0xf0] %vm221_vm2, %v508_v27 }
0x1182   :  { %v652_v38 = vpop.permute.xlu0 %651 }
0x1183   :  { %654 = vst.msk [vmem:[#allocation2 + $0x18] sm:$0xf0] %vm221_vm2, %v652_v38 }
0x1184   :  { %655 = vst.msk [vmem:[#allocation4 - $0x4] sm:$0xf0] %vm221_vm2, %v652_v38  ;;  %668 = dma.vmem_to_hbm [thread:$0]  %s661_s18, 512, %s663_s21, [#allocation3], %s829_s27, %s829_s27, %s830_s28  }
0x1185   :  { %679 = dma.vmem_to_hbm [thread:$0]  %s675_s23, 64, %s677_s26, [#allocation5]  }
0x1186   :  { %818 = dma.done.wait [#allocation3], 512  }
0x1187   :  { %819 = vsyncadd [#allocation3], 4294966784 }
0x1188   :  { %820 = dma.done.wait [#allocation5], 64  }
0x1189   :  { %821 = vsyncadd [#allocation5], 4294967232 }
0x118a   :  { %688 = vsyncpa [#allocation3], 1 }
0x118b   :  { %689 = vsyncpa [#allocation5], 1 }

</bundles_post_ra>
